<compile_context>
chip_gen: v7x
topology: tpu7x:2x2x1
jax: 0.10.0
libtpu: 0.0.40
codegen_flags: <defaults>
</compile_context>

<pallas_src>
import functools

import jax
import jax.numpy as jnp
from jax import lax
from jax.experimental import pallas as pl
from jax.experimental.pallas import tpu as pltpu


def _round_up(x, m):
    return ((x + m - 1) // m) * m


def _modulation(pt, gamma):
    """(1 - pt) ** gamma, specialised on the compile-time constant gamma."""
    if gamma == 0.0:
        return None                       # factor of 1.0 -> skip the multiply entirely
    one_m_pt = 1.0 - pt
    if float(gamma).is_integer() and 0.0 < gamma <= 4.0:
        mod = one_m_pt                    # small integer gamma -> repeated VPU multiplies
        for _ in range(int(gamma) - 1):
            mod = mod * one_m_pt
        return mod
    # Non-integer gamma: clamp the base at 0 so round-off (pt marginally > 1) cannot NaN.
    return jnp.maximum(one_m_pt, 0.0) ** jnp.float32(gamma)


def _focal_loss_kernel(logits_ref, target_ref, *rest, gamma, use_alpha,
                       samples_per_row, tile_lanes, tiles_per_core):
    """One (classes x lane-tile) block: classes on sublanes, samples on lanes."""
    if use_alpha:
        at_ref, out_ref = rest
    else:
        at_ref = None
        (out_ref,) = rest

    c = pl.program_id(0)      # core / partial-sum index ("parallel")
    r = pl.program_id(1)      # outer row (batch element for the ndim > 2 path)
    t = pl.program_id(2)      # lane tile within this core's share

    # Zero this core's resident lane-vector accumulator at its first step.
    @pl.when((r == 0) & (t == 0))
    def _init():
        out_ref[...] = jnp.zeros_like(out_ref)

    x = logits_ref[...].astype(jnp.float32)     # (N, TL): native dtype on the wire
    tgt = target_ref[...]                       # (1, TL) int32

    # log_softmax over the class (sublane) axis.
    m = jnp.max(x, axis=0, keepdims=True)                        # (1, TL)
    z = x - m
    lse = jnp.log(jnp.sum(jnp.exp(z), axis=0, keepdims=True))    # (1, TL)

    # gather(1, target): one-hot select over the N sublanes + one sublane reduce.
    cls = lax.broadcasted_iota(jnp.int32, x.shape, 0)            # (N, TL)
    onehot = cls == tgt
    z_t = jnp.sum(jnp.where(onehot, z, 0.0), axis=0, keepdims=True)
    logpt = z_t - lse                                            # (1, TL)
    pt = jnp.exp(logpt)

    # alpha.gather(0, target) was hoisted to the wrapper -> lane-dense at_ref.
    weighted = logpt * at_ref[...] if use_alpha else logpt

    mod = _modulation(pt, gamma)
    loss = -weighted if mod is None else -(mod * weighted)       # (1, TL)

    # Mask lanes that hang past the real row length (partial / duplicated OOB tiles).
    lane = lax.broadcasted_iota(jnp.int32, loss.shape, 1)
    start = (c * tiles_per_core + t) * tile_lanes
    valid = (start + lane) < samples_per_row
    # jnp.where (select), not a multiply: garbage / NaN reads cannot leak into the sum.
    out_ref[...] += jnp.where(valid, loss, 0.0)


def _choose_tile_lanes(samples_per_row, n_classes, itemsize, requested):
    """Lane-tile size targeting ~6 MiB per pipeline buffer (safe on v5e/v6e/v7x)."""
    if requested is not None:
        tl = max(128, (int(requested) // 128) * 128)
    else:
        # Sublane padding granule for the second-minor dim: f32 -> 8, bf16 -> 16, int8 -> 32.
        granule = 8 * max(1, 4 // itemsize)
        bytes_per_lane = _round_up(n_classes, granule) * itemsize
        tl = max(128, ((6 << 20) // bytes_per_lane // 128) * 128)
    if samples_per_row <= tl:
        return samples_per_row     # single tile; block == full lane extent is always legal
    return tl


def focal_loss(logits, target, alpha=None, gamma=0.0, size_average=True,
               tile_lanes=None, num_cores=2):
    """Pallas TPU implementation of FocalLoss.forward (returns a scalar)."""
    if logits.ndim > 2:
        # PyTorch flattens (B, C, *) -> (B*prod(*), C).  We keep the NATIVE (B, C, HW)
        # layout instead (no transpose copy): classes already sit on the sublane axis
        # and the spatial axis rides the 128 lanes.
        b, n = logits.shape[0], logits.shape[1]
        logits_nat = logits.reshape(b, n, -1)                    # (B, C, HW), free reshape
        rows, lanes = b, logits_nat.shape[2]
    else:
        b, n = logits.shape
        # Small-N case: flip so the batch rides the lane axis, classes the sublanes.
        logits_nat = jnp.transpose(logits, (1, 0)).reshape(1, n, b)   # (1, N, B)
        rows, lanes = 1, b
    total = rows * lanes

    target2 = target.reshape(rows, lanes).astype(jnp.int32)
    target_nat = target2.reshape(rows, 1, lanes)                 # lane-dense int32 targets

    use_alpha = alpha is not None
    args = [logits_nat, target_nat]
    if use_alpha:
        if isinstance(alpha, (int, float)) and not isinstance(alpha, bool):
            # Module's binary-classification convenience form: alpha -> [alpha, 1 - alpha].
            if n != 2:
                raise ValueError(
                    f"scalar alpha is only defined for binary classification (N == 2), got N == {n}")
            alpha_arr = jnp.array([alpha, 1.0 - alpha], jnp.float32)
        else:
            alpha_arr = jnp.asarray(alpha, jnp.float32).reshape(-1)
            if alpha_arr.shape[0] != n:
                raise ValueError(f"alpha has {alpha_arr.shape[0]} entries, expected {n}")
        # Hoist alpha.gather(0, target) out of the kernel: tiny XLA gather, shipped as a
        # lane-dense (1, TL) block per tile.
        at_nat = alpha_arr[target2].reshape(rows, 1, lanes)
        args.append(at_nat)

    itemsize = jnp.dtype(logits.dtype).itemsize
    tl = _choose_tile_lanes(lanes, n, itemsize, tile_lanes)
    n_tiles = pl.cdiv(lanes, tl)
    nc = max(1, int(num_cores))              # leading "parallel" axis (v7x megacore)
    tiles_per_core = pl.cdiv(n_tiles, nc)
    grid = (nc, rows, tiles_per_core)

    def lane_tile(c, t):
        # Clamp duplicated / out-of-range tiles back in bounds for the DMA; their
        # contribution is masked to zero in-kernel (the mask uses the UNCLAMPED index).
        return jnp.minimum(c * tiles_per_core + t, n_tiles - 1)

    data_spec = pl.BlockSpec((None, n, tl), lambda c, r, t: (r, 0, lane_tile(c, t)))
    side_spec = pl.BlockSpec((None, 1, tl), lambda c, r, t: (r, 0, lane_tile(c, t)))
    in_specs = [data_spec, side_spec] + ([side_spec] if use_alpha else [])
    # NOTE: if a profile ever shows exposed DMA at these tile sizes, bump the logits spec
    # to pipeline_mode=pl.Buffered(3); default double-buffering is enough here.

    kernel = functools.partial(
        _focal_loss_kernel,
        gamma=float(gamma),
        use_alpha=use_alpha,
        samples_per_row=lanes,
        tile_lanes=tl,
        tiles_per_core=tiles_per_core,
    )

    partials = pl.pallas_call(
        kernel,
        out_shape=jax.ShapeDtypeStruct((nc, 1, tl), jnp.float32),
        grid=grid,
        in_specs=in_specs,
        # Per-core resident lane-dense accumulator block.
        out_specs=pl.BlockSpec((None, 1, tl), lambda c, r, t: (c, 0, 0)),
        compiler_params=pltpu.CompilerParams(
            # Lane tiles are split across TensorCores on v7x; the row / tile axes are the
            # per-core reduction loop.
            dimension_semantics=("parallel", "arbitrary", "arbitrary"),
            # 2 x ~6 MiB logits buffers + lane-dense side inputs stay well inside 32 MiB,
            # which is safe on v5e (128 MiB), v6e (128 MiB) and v7x (64 MiB) alike.
            vmem_limit_bytes=32 << 20,
        ),
    )(*args)

    loss_sum = jnp.sum(partials)             # tiny (nc * TL) reduce in XLA
    return loss_sum / jnp.float32(total) if size_average else loss_sum


def _focal_loss_ref(logits, target, alpha, gamma, size_average):
    """Plain-JAX reference mirroring the PyTorch module."""
    logp = jax.nn.log_softmax(logits.astype(jnp.float32), axis=1)
    logpt = jnp.take_along_axis(logp, target.reshape(-1, 1), axis=1).reshape(-1)
    pt = jnp.exp(logpt)
    if alpha is not None:
        at = jnp.asarray(alpha, jnp.float32)[target.reshape(-1)]
        logpt = logpt * at
    loss = -1.0 * (1.0 - pt) ** gamma * logpt
    return jnp.mean(loss) if size_average else jnp.sum(loss)


if __name__ == "__main__":
    key = jax.random.PRNGKey(0)
    k1, k2, k3, k4, k5, k6, k7, k8 = jax.random.split(key, 8)

    # Case 1: the ACRNN use case -- (B, N) logits, per-class alpha, gamma=2, mean.
    B, N = 8, 4
    alpha = [0.1, 0.2, 0.3, 0.4]
    logits = jax.random.normal(k1, (B, N), dtype=jnp.float32)
    target = jax.random.randint(k2, (B,), 0, N, dtype=jnp.int32)
    loss = jax.block_until_ready(
        focal_loss(logits, target, alpha=alpha, gamma=2.0, size_average=True))
    ref = _focal_loss_ref(logits, target, alpha, 2.0, True)
    assert jnp.allclose(loss, ref, rtol=1e-4, atol=1e-5), (loss, ref)

    # Case 2: ndim > 2 path in NATIVE (B, C, HW) layout, bf16 on the wire, summed loss,
    # tile_lanes=128 so the two 128-wide spatial tiles land on different "cores".
    Bc, C, H, W = 2, 4, 16, 16
    logits4 = jax.random.normal(k3, (Bc, C, H, W), dtype=jnp.float32).astype(jnp.bfloat16)
    target4 = jax.random.randint(k4, (Bc * H * W,), 0, C, dtype=jnp.int32)
    loss4 = jax.block_until_ready(
        focal_loss(logits4, target4, alpha=None, gamma=0.0, size_average=False,
                   tile_lanes=128))
    flat = jnp.transpose(logits4.reshape(Bc, C, H * W), (0, 2, 1)).reshape(-1, C)
    ref4 = _focal_loss_ref(flat, target4, None, 0.0, False)
    assert jnp.allclose(loss4, ref4, rtol=1e-3, atol=1e-2), (loss4, ref4)

    # Case 3: batch not a multiple of the lane tile, non-integer gamma (clamped pow path),
    # multi-tile accumulation + a fully-masked duplicated tile on the second core.
    B3 = 300
    x3 = jax.random.normal(k5, (B3, N), dtype=jnp.float32)
    y3 = jax.random.randint(k6, (B3,), 0, N, dtype=jnp.int32)
    loss3 = jax.block_until_ready(
        focal_loss(x3, y3, alpha=None, gamma=1.5, size_average=True, tile_lanes=128))
    ref3 = _focal_loss_ref(x3, y3, None, 1.5, True)
    assert jnp.allclose(loss3, ref3, rtol=1e-4, atol=1e-5), (loss3, ref3)

    # Case 4: binary classification with the module's scalar-alpha convenience form.
    B4 = 16
    x2 = jax.random.normal(k7, (B4, 2), dtype=jnp.float32)
    y2 = jax.random.randint(k8, (B4,), 0, 2, dtype=jnp.int32)
    loss2 = jax.block_until_ready(
        focal_loss(x2, y2, alpha=0.25, gamma=2.0, size_average=False))
    ref2 = _focal_loss_ref(x2, y2, [0.25, 0.75], 2.0, False)
    assert jnp.allclose(loss2, ref2, rtol=1e-4, atol=1e-5), (loss2, ref2)

    print("KERNEL_OK")
</pallas_src>

<mosaic_0001>
module attributes {stable_mosaic.version = 11 : i64} {
  func.func @_focal_loss_kernel(%arg0: i32, %arg1: i32, %arg2: i32, %arg3: memref<1x4x8xf32, #tpu.memory_space<vmem>>, %arg4: memref<1x1x8xi32, #tpu.memory_space<vmem>>, %arg5: memref<1x1x8xf32, #tpu.memory_space<vmem>>, %arg6: memref<1x1x8xf32, #tpu.memory_space<vmem>>) attributes {dimension_semantics = [#tpu.dimension_semantics<parallel>, #tpu.dimension_semantics<arbitrary>, #tpu.dimension_semantics<arbitrary>], iteration_bounds = array<i64: 2, 1, 1>, scalar_prefetch = 0 : i64, scratch_operands = 0 : i64, tpu.core_type = #tpu.core_type<tc>, window_params = [{transform_indices = @transform_0, window_bounds = array<i64: 1, 4, 8>}, {transform_indices = @transform_1, window_bounds = array<i64: 1, 1, 8>}, {transform_indices = @transform_2, window_bounds = array<i64: 1, 1, 8>}, {transform_indices = @transform_3, window_bounds = array<i64: 1, 1, 8>}]} {
    %c0_i32 = arith.constant 0 : i32
    %0 = arith.cmpi eq, %arg1, %c0_i32 : i32
    %c0_i32_0 = arith.constant 0 : i32
    %1 = arith.cmpi eq, %arg2, %c0_i32_0 : i32
    %2 = arith.andi %0, %1 : i1
    %3 = arith.extui %2 : i1 to i32
    %c0_i32_1 = arith.constant 0 : i32
    %4 = arith.cmpi ne, %3, %c0_i32_1 : i32
    scf.if %4 {
      %cst_23 = arith.constant 0.000000e+00 : f32
      %51 = vector.broadcast %cst_23 : f32 to vector<1x8xf32>
      %c0_24 = arith.constant 0 : index
      %c0_25 = arith.constant 0 : index
      %c0_26 = arith.constant 0 : index
      %52 = vector.load %arg6[%c0_24, %c0_25, %c0_26] : memref<1x1x8xf32, #tpu.memory_space<vmem>>, vector<1x1x8xf32>
      %53 = vector.shape_cast %52 : vector<1x1x8xf32> to vector<1x8xf32>
      %54 = vector.shape_cast %51 : vector<1x8xf32> to vector<1x1x8xf32>
      tpu.vector_store %arg6[%c0_24, %c0_25, %c0_26], %54 {strides = array<i32>} : memref<1x1x8xf32, #tpu.memory_space<vmem>>, vector<1x1x8xf32>,
    } else {
    }
    %c0 = arith.constant 0 : index
    %c0_2 = arith.constant 0 : index
    %c0_3 = arith.constant 0 : index
    %5 = vector.load %arg3[%c0, %c0_2, %c0_3] : memref<1x4x8xf32, #tpu.memory_space<vmem>>, vector<1x4x8xf32>
    %6 = vector.shape_cast %5 : vector<1x4x8xf32> to vector<4x8xf32>
    %c0_4 = arith.constant 0 : index
    %c0_5 = arith.constant 0 : index
    %c0_6 = arith.constant 0 : index
    %7 = vector.load %arg4[%c0_4, %c0_5, %c0_6] : memref<1x1x8xi32, #tpu.memory_space<vmem>>, vector<1x1x8xi32>
    %8 = vector.shape_cast %7 : vector<1x1x8xi32> to vector<1x8xi32>
    %cst = arith.constant dense<0xFF800000> : vector<8xf32>
    %9 = vector.multi_reduction <maximumf>, %6, %cst [0] : vector<4x8xf32> to vector<8xf32>
    %10 = vector.shape_cast %9 : vector<8xf32> to vector<1x8xf32>
    %11 = vector.broadcast %10 : vector<1x8xf32> to vector<4x8xf32>
    %12 = arith.subf %6, %11 : vector<4x8xf32>
    %13 = math.exp %12 : vector<4x8xf32>
    %cst_7 = arith.constant dense<0.000000e+00> : vector<8xf32>
    %14 = vector.multi_reduction <add>, %13, %cst_7 [0] : vector<4x8xf32> to vector<8xf32>
    %15 = vector.shape_cast %14 : vector<8xf32> to vector<1x8xf32>
    %16 = math.log %15 : vector<1x8xf32>
    %17 = tpu.iota {dimensions = array<i32: 0>} : vector<4x8xi32>
    %18 = vector.broadcast %8 : vector<1x8xi32> to vector<4x8xi32>
    %19 = arith.cmpi eq, %17, %18 : vector<4x8xi32>
    %cst_8 = arith.constant 0.000000e+00 : f32
    %20 = vector.broadcast %cst_8 : f32 to vector<4x8xf32>
    %21 = arith.select %19, %12, %20 : vector<4x8xi1>, vector<4x8xf32>
    %cst_9 = arith.constant dense<0.000000e+00> : vector<8xf32>
    %22 = vector.multi_reduction <add>, %21, %cst_9 [0] : vector<4x8xf32> to vector<8xf32>
    %23 = vector.shape_cast %22 : vector<8xf32> to vector<1x8xf32>
    %24 = arith.subf %23, %16 : vector<1x8xf32>
    %25 = math.exp %24 : vector<1x8xf32>
    %c0_10 = arith.constant 0 : index
    %c0_11 = arith.constant 0 : index
    %c0_12 = arith.constant 0 : index
    %26 = vector.load %arg5[%c0_10, %c0_11, %c0_12] : memref<1x1x8xf32, #tpu.memory_space<vmem>>, vector<1x1x8xf32>
    %27 = vector.shape_cast %26 : vector<1x1x8xf32> to vector<1x8xf32>
    %28 = arith.mulf %24, %27 : vector<1x8xf32>
    %cst_13 = arith.constant 1.000000e+00 : f32
    %29 = vector.broadcast %cst_13 : f32 to vector<1x8xf32>
    %30 = arith.subf %29, %25 : vector<1x8xf32>
    %31 = arith.mulf %30, %30 : vector<1x8xf32>
    %32 = arith.mulf %31, %28 : vector<1x8xf32>
    %cst_14 = arith.constant 0.000000e+00 : f32
    %33 = vector.broadcast %cst_14 : f32 to vector<1x8xf32>
    %34 = arith.subf %33, %32 : vector<1x8xf32>
    %35 = tpu.iota {dimensions = array<i32: 1>} : vector<1x8xi32>
    %c1_i32 = arith.constant 1 : i32
    %36 = arith.muli %arg0, %c1_i32 : i32
    %37 = arith.addi %36, %arg2 : i32
    %c8_i32 = arith.constant 8 : i32
    %38 = arith.muli %37, %c8_i32 : i32
    %39 = vector.broadcast %38 : i32 to vector<1x8xi32>
    %40 = arith.addi %39, %35 : vector<1x8xi32>
    %c8_i32_15 = arith.constant 8 : i32
    %41 = vector.broadcast %c8_i32_15 : i32 to vector<1x8xi32>
    %42 = arith.cmpi slt, %40, %41 : vector<1x8xi32>
    %c0_16 = arith.constant 0 : index
    %c0_17 = arith.constant 0 : index
    %c0_18 = arith.constant 0 : index
    %43 = vector.load %arg6[%c0_16, %c0_17, %c0_18] : memref<1x1x8xf32, #tpu.memory_space<vmem>>, vector<1x1x8xf32>
    %44 = vector.shape_cast %43 : vector<1x1x8xf32> to vector<1x8xf32>
    %cst_19 = arith.constant 0.000000e+00 : f32
    %45 = vector.broadcast %cst_19 : f32 to vector<1x8xf32>
    %46 = arith.select %42, %34, %45 : vector<1x8xi1>, vector<1x8xf32>
    %47 = arith.addf %44, %46 : vector<1x8xf32>
    %c0_20 = arith.constant 0 : index
    %c0_21 = arith.constant 0 : index
    %c0_22 = arith.constant 0 : index
    %48 = vector.load %arg6[%c0_20, %c0_21, %c0_22] : memref<1x1x8xf32, #tpu.memory_space<vmem>>, vector<1x1x8xf32>
    %49 = vector.shape_cast %48 : vector<1x1x8xf32> to vector<1x8xf32>
    %50 = vector.shape_cast %47 : vector<1x8xf32> to vector<1x1x8xf32>
    tpu.vector_store %arg6[%c0_20, %c0_21, %c0_22], %50 {strides = array<i32>} : memref<1x1x8xf32, #tpu.memory_space<vmem>>, vector<1x1x8xf32>,
    return
  }
  func.func @transform_0(%arg0: i32, %arg1: i32, %arg2: i32) -> (i32, i32, i32) {
    %c1_i32 = arith.constant 1 : i32
    %0 = arith.muli %arg0, %c1_i32 : i32
    %1 = arith.addi %0, %arg2 : i32
    %c0_i32 = arith.constant 0 : i32
    %2 = arith.minsi %1, %c0_i32 : i32
    %c0_i32_0 = arith.constant 0 : i32
    %c0_i32_1 = arith.constant 0 : i32
    return %arg1, %c0_i32_0, %2 : i32, i32, i32
  }
  func.func @transform_1(%arg0: i32, %arg1: i32, %arg2: i32) -> (i32, i32, i32) {
    %c1_i32 = arith.constant 1 : i32
    %0 = arith.muli %arg0, %c1_i32 : i32
    %1 = arith.addi %0, %arg2 : i32
    %c0_i32 = arith.constant 0 : i32
    %2 = arith.minsi %1, %c0_i32 : i32
    %c0_i32_0 = arith.constant 0 : i32
    %c0_i32_1 = arith.constant 0 : i32
    return %arg1, %c0_i32_0, %2 : i32, i32, i32
  }
  func.func @transform_2(%arg0: i32, %arg1: i32, %arg2: i32) -> (i32, i32, i32) {
    %c1_i32 = arith.constant 1 : i32
    %0 = arith.muli %arg0, %c1_i32 : i32
    %1 = arith.addi %0, %arg2 : i32
    %c0_i32 = arith.constant 0 : i32
    %2 = arith.minsi %1, %c0_i32 : i32
    %c0_i32_0 = arith.constant 0 : i32
    %c0_i32_1 = arith.constant 0 : i32
    return %arg1, %c0_i32_0, %2 : i32, i32, i32
  }
  func.func @transform_3(%arg0: i32, %arg1: i32, %arg2: i32) -> (i32, i32, i32) {
    %c0_i32 = arith.constant 0 : i32
    %c0_i32_0 = arith.constant 0 : i32
    %c0_i32_1 = arith.constant 0 : i32
    return %arg0, %c0_i32, %c0_i32_0 : i32, i32, i32
  }
}

</mosaic_0001>

<bundles_post_ra>
// kernel: tpu_custom_call.1
= control target key start
LH: loop header
LB: loop body
LE: loop exit
PB: predicated region body
PF: predicated region fallthrough
CT: control target
= control target key end

     0   :  { %8 = vsyncpa [#allocation3], 0  ;;  %s955_s0 = inlined_call_operand.hbm [shape: f32[1,4,8], index: 0, kind: input, shape index: {}]   ;;  %s956_s1 = inlined_call_operand.vmem [shape: s32[1,1,8], index: 1, kind: input, shape index: {}]   ;;  %s957_s2 = inlined_call_operand.vmem [shape: f32[1,1,8], index: 2, kind: input, shape index: {}]   ;;  %s958_s3 = inlined_call_operand.hbm [shape: f32[2,1,8], index: 3, kind: output, shape index: {}]  }
   0x1   :  { %10 = vsyncpa [#allocation3 + $0x1], 0 }
   0x2   :  { %11 = vsyncpa [#allocation4], 0 }
   0x3   :  { %13 = vsyncpa [#allocation4 + $0x1], 0  ;;  %s762_s12 = smov 0   ;;  %s764_s13 = smov 0  }
   0x4   :  { %s766_s14 = smov 0   ;;  %s768_s15 = smov 0  }
   0x5   :  { %s770_s16 = smov 0   ;;  %s772_s17 = smov 0  }
   0x6   :  { %s774_s18 = smov 0   ;;  %s776_s19 = smov 0  }
   0x7 LB: > { %s492_s20 = sadd.s32 4294967295, %s737_s19   ;;  %s493_s21 = sadd.s32 4294967294, %s737_s19   ;;  %s737_s19 = sphi %s776_s19, %s19_s19   ;;  %s733_s18 = sphi %s774_s18, %s979_s18   ;;  %s729_s17 = sphi %s772_s17, %s978_s17   ;;  %s725_s16 = sphi %s770_s16, %s945_s16   ;;  %s721_s15 = sphi %s768_s15, %s977_s15   ;;  %s717_s14 = sphi %s766_s14, %s976_s14   ;;  %s713_s13 = sphi %s764_s13, %s975_s13   ;;  %s709_s12 = sphi %s762_s12, %s974_s12  }
   0x8   : > { %s38_s22 = sadd.s32 1, %s733_s18  ;;  %p706_p1 = scmp.ne.s32.totalorder %s725_s16, 0 }
   0x9   : > { %p40_p0 = scmp.ge.s32.totalorder %s38_s22, 2  ;;  %p61_p2 = scmp.eq.s32.totalorder %s737_s19, 0 }
   0xa   : > { %p66_p3 = scmp.ne.s32.totalorder %s725_s16, %s721_s15  ;;  %p67_p5 = scmp.eq.s32.totalorder %s492_s20, 0 }
   0xb   : > { %s981_s22 = smov (%p40_p0, %s38_s22), 0  ;;  %p808_p4 = por %p706_p1, %p61_p2 }
   0xc   : > { %p812_p6 = por %p67_p5, %p66_p3  ;;  %s144_s25 = ssub.s32 %s733_s18, %s981_s22 }
   0xd   : > { %p145_p7 = scmp.eq.s32.totalorder %s144_s25, 0  ;;  %s147_s26 = sadd.s32 1, %s717_s14 }
   0xe   : > { %s963_s24 = scalar_select %p812_p6, 1, 0 }
   0xf   : > { %s820_s27 = scalar_select %p145_p7, %s717_s14, %s147_s26  }
  0x10   : > { %p157_p8 = scmp.ne.s32.totalorder %s717_s14, %s713_s13  ;;  %p158_p9 = scmp.eq.s32.totalorder %s492_s20, 1 }
  0x11   : > { %p163_p10 = scmp.ne.s32.totalorder %s713_s13, %s709_s12  ;;  %p164_p11 = scmp.eq.s32.totalorder %s493_s21, 1 }
  0x12   : > { %p826_p12 = por %p158_p9, %p157_p8  ;;  %p523_p1 = scmp.lt.s32.totalorder %s737_s19, 2 }
  0x13   : > { %p831_p0 = por %p164_p11, %p163_p10  ;;  %s739_s30 = smov [#allocation2]  }
  0x14   : > { %s964_s28 = scalar_select %p826_p12, 1, 0 }
  0x15   : > { %s965_s29 = scalar_select %p831_p0, 1, 0 }
  0x16   : > { %s199_s4 = sshll.u32 %s739_s30, 4  ;;  %p838_p2 = pnand %p523_p1, %p808_p4  ;;  %s200_s4 = int_to_ptr.vmem [resolvable:$true] %s199_s4 }
  0x17   : > { %s604_s8 = scalar_lea.hbm %s955_s0, 64 }
  0x18   : > { %s966_s5 = scalar_select %p838_p2, 1, 0 }
  0x19   : > { %p605_p7 = scmp.ne.s32.totalorder %s955_s0, %s604_s8  ;;  %p606_p8 = pneg %p838_p2 }
  0x1a   : > { %p611_p4 = scmp.lt.u32.totalorder %s604_s8, %s604_s8  ;;  %p613_p11 = scmp.lt.u32.totalorder %s604_s8, %s955_s0 }
  0x1b   : > { %p607_p9 = pnand %p606_p8, %p605_p7 }
  0x1c   : > { %p614_p1 = por %p613_p11, %p611_p4 }
  0x1d   : > { %p608_p10 = pneg %p607_p9 }
  0x1f   : > { %p615_p13 = pnand %p614_p1, %p608_p10 }
  0x21   : > { %618 = shalt.err (!%p615_p13)
}
  0x22   : > { %s619_s20 = scalar_lea.vmem %s200_s4, 64  ;;  %s626_s21 = scalar_lea.vmem %s200_s4, 128 }
  0x23   : > { %p620_p3 = scmp.ne.s32.totalorder %s200_s4, %s619_s20  ;;  %p627_p12 = scmp.lt.s32.totalorder %s200_s4, %s200_s4 }
  0x24   : > { %p628_p6 = scmp.lt.s32.totalorder %s626_s21, %s619_s20 }
  0x25   : > { %p622_p5 = pnand %p620_p3, %p606_p8 }
  0x26   : > { %p629_p2 = por %p628_p6, %p627_p12 }
  0x27   : > { %p623_p0 = pneg %p622_p5 }
  0x29   : > { %p630_p7 = pnand %p629_p2, %p623_p0 }
  0x2b   : > { %633 = shalt.err (!%p630_p7)
}
  0x2c   : > { %p967_p9 = scmp.ne.s32.totalorder %s966_s5, 0  ;;  %p968_p10 = scmp.lt.s32.totalorder %s737_s19, 3 }
  0x2d   : > { %p969_p13 = scmp.ge.s32.totalorder %s737_s19, 1 }
  0x2e   : > { %518 = dma.hbm_to_vmem [thread:$0]  (!%p967_p9), %s955_s0, 64, %s200_s4, [#allocation3]  }
  0x2f   : > { %p235_p4 = pnand %p969_p13, %p968_p10 }
  0x30   : > { %s240_s26 = sand.u32 (!%p235_p4), 1, %s725_s16   ;;  %p970_p6 = scmp.ne.s32.totalorder (!%p235_p4), %s963_s24, 0 }
  0x31   : > { %238 = sbr.rel (%p235_p4) target bundleno = 153 (0x99), region = 32  ;;  %s499_s30 = sshll.u32 (!%p235_p4), %s240_s26, 2 }
  0x32   : > { %s241_s6 = scalar_lea.sflag (!%p235_p4), [#allocation3], %s240_s26  ;;  %s244_s7 = scalar_lea.vmem (!%p235_p4), [#allocation2], %s499_s30 }
  0x38   : > { %699 = dma.done.wait (%p970_p6), %s241_s6, 64  }
  0x39   : > { %701 = vsyncadd (%p970_p6), %s241_s6, 4294967232  ;;  %s282_s4 = sand.u32 1, %s713_s13   ;;  %vm317_vm0 = vcmask 57344   ;;  %v740_v0 = vmov 0.0   ;;  %vm321_vm1 = vcmask 60416   ;;  %p288_p12 = scmp.lt.s32.totalorder %s729_s17, 0  ;;  %v341_v10 = vlaneseq }
  0x3a   : > { %s872_s5 = scalar_lea.vmem [#allocation5], %s282_s4  ;;  %v319_v1 = vld [vmem:[%s244_s7] sm:$0xf]  ;;  %s507_s21 = sshll.u32 %s729_s17, 3 }
  0x3b   : > { %318 = vst.msk [vmem:[%s872_s5] sm:$0x1] %vm317_vm0, %v740_v0  ;;  %v322_v2 = vsel %vm321_vm1, %v319_v1, -inf  ;;  %s289_s24 = scalar_select %p288_p12, %s729_s17, 0  ;;  %v342_v12 = vshrl.u32 %v341_v10, 7  ;;  %v366_v35 = vand.u32 127, %v341_v10  ;;  %v369_v36 = vstv %s507_s21 }
  0x3c   : > { %v323_v3 = vrot.slane %v322_v2, 4  ;;  %s508_s23 = sshll.u32 %s729_s17, 4  ;;  %s390_s25 = sshll.u32 %s872_s5, 4  ;;  %s900_s25 = int_to_ptr.vmem [resolvable:$true] %s390_s25 }
  0x3d   : > { %s983_s24 = smov (!%p288_p12, %s289_s24), 0  ;;  %v370_v40 = vadd.s32 %v369_v36, %v366_v35  ;;  %s898_s6 = scalar_lea.hbm %s958_s3, %s508_s23 }
  0x3e   : > { %v324_v4 = vmax.f32 %v322_v2, %v323_v3  ;;  %s295_s10 = scalar_lea.vmem %s956_s1, %s983_s24  ;;  %s307_s20 = scalar_lea.vmem %s957_s2, %s983_s24 }
  0x3f   : > { %v506_v13 = vld [vmem:[%s295_s10] ss:$0 sm:$0xff]  ;;  %vm371_vm3 = vcmp.lt.s32.totalorder %v370_v40, 8  ;;  %s378_s7 = scalar_lea.sflag [#allocation4], %s282_s4  ;;  %s634_s24 = scalar_lea.vmem %s900_s25, 16 }
  0x40   : > { %v325_v5 = vrot.slane %v324_v4, 2  ;;  %vm347_vm2 = vcmp.eq.s32.totalorder %v342_v12, %v506_v13  ;;  %v359_v34 = vld [vmem:[%s307_s20] sm:$0x1]  ;;  %p635_p0 = scmp.ne.s32.totalorder %s900_s25, %s634_s24  ;;  %p971_p2 = scmp.ne.s32.totalorder %s964_s28, 0 }
  0x41   : > { %s741_s17 = smov [#allocation5]  }
  0x42   : > { %v326_v6 = vmax.f32 %v324_v4, %v325_v5  ;;  %v372_v44 = vld [vmem:[%s872_s5] sm:$0x1]  ;;  %p636_p3 = pnand %p635_p0, %p971_p2  ;;  %s638_s8 = sshll.u32 %s741_s17, 4  ;;  %s639_s8 = int_to_ptr.vmem [resolvable:$false] %s638_s8 }
  0x43   : > { %s640_s9 = scalar_lea.vmem %s639_s8, 32  ;;  %p641_p8 = scmp.lt.s32.totalorder %s900_s25, %s639_s8 }
  0x44   : > { %v327_v7 = vrot.slane %v326_v6, 1  ;;  %p637_p5 = pneg %p636_p3  ;;  %p642_p11 = scmp.lt.s32.totalorder %s640_s9, %s634_s24 }
  0x46   : > { %v328_v8 = vmax.f32 %v326_v6, %v327_v7  ;;  %p643_p1 = por %p642_p11, %p641_p8 }
  0x48   : > { %v329_v9 = vsub.f32 %v319_v1, %v328_v8  ;;  %p644_p7 = pnand %p643_p1, %p637_p5 }
  0x4a   : > { %v330_v11 = vmul.f32 1.442695, %v329_v9  ;;  %v348_v14 = vsel %vm347_vm2, %v329_v9, 0.0 }
  0x4b   : > { %v349_v16 = vsel %vm321_vm1, %v348_v14, 0.0 }
  0x4c   : > { %598 = vpow2.f32 %v330_v11  ;;  %v350_v19 = vrot.slane %v349_v16, 4 }
  0x4e   : > { %v351_v22 = vadd.f32 %v350_v19, %v349_v16 }
  0x50   : > { %v352_v25 = vrot.slane %v351_v22, 2 }
  0x52   : > { %v353_v27 = vadd.f32 %v352_v25, %v351_v22 }
  0x54   : > { %v354_v28 = vrot.slane %v353_v27, 1 }
  0x56   : > { %v599_v15 = vpop.eup %598  ;;  %v355_v29 = vadd.f32 %v354_v28, %v353_v27 }
  0x57   : > { %v332_v17 = vsel %vm321_vm1, %v599_v15, 0.0 }
  0x58   : > { %v333_v18 = vrot.slane %v332_v17, 4 }
  0x5a   : > { %v334_v20 = vadd.f32 %v333_v18, %v332_v17 }
  0x5c   : > { %v335_v21 = vrot.slane %v334_v20, 2 }
  0x5e   : > { %v336_v23 = vadd.f32 %v335_v21, %v334_v20 }
  0x60   : > { %v337_v24 = vrot.slane %v336_v23, 1 }
  0x62   : > { %v338_v26 = vadd.f32 %v337_v24, %v336_v23 }
  0x64   : > { %600 = vlog2.f32 %v338_v26 }
  0x6e   : > { %v601_v30 = vpop.eup %600 }
  0x6f   : > { %v340_v31 = vmul.f32 0.6931472, %v601_v30 }
  0x71   : > { %v356_v32 = vsub.f32 %v355_v29, %v340_v31 }
  0x73   : > { %v357_v33 = vmul.f32 1.442695, %v356_v32  ;;  %v360_v38 = vmul.f32 %v359_v34, %v356_v32 }
  0x75   : > { %602 = vpow2.f32 %v357_v33 }
  0x7f   : > { %v603_v37 = vpop.eup %602 }
  0x80   : > { %v361_v39 = vsub.f32 1.0, %v603_v37 }
  0x82   : > { %v362_v41 = vmul.f32 %v361_v39, %v361_v39 }
  0x84   : > { %v363_v42 = vmul.f32 %v362_v41, %v360_v38 }
  0x86   : > { %v364_v43 = vsub.f32 0.0, %v363_v42 }
  0x88   : > { %v373_v45 = vsel %vm371_vm3, %v364_v43, 0.0 }
  0x89   : > { %v374_v46 = vadd.f32 %v373_v45, %v372_v44 }
  0x8b   : > { %376 = vst.msk [vmem:[%s872_s5] sm:$0x1] %vm317_vm0, %v374_v46 }
  0x8c   : > { %647 = shalt.err (!%p644_p7)
}
  0x8d   : > { %s648_s4 = scalar_lea.hbm %s898_s6, 16  ;;  %s652_s11 = scalar_lea.hbm %s958_s3, 32 }
  0x8e   : > { %p649_p9 = scmp.ne.s32.totalorder %s898_s6, %s648_s4  ;;  %p653_p4 = scmp.lt.u32.totalorder %s898_s6, %s958_s3 }
  0x8f   : > { %p654_p6 = scmp.lt.u32.totalorder %s652_s11, %s648_s4  ;;  %p656_p0 = scmp.lt.u32.totalorder %s648_s4, %s898_s6 }
  0x90   : > { %p650_p10 = pnand %p649_p9, %p971_p2 }
  0x91   : > { %p655_p12 = por %p654_p6, %p653_p4 }
  0x92   : > { %p651_p13 = pneg %p650_p10 }
  0x93   : > { %p657_p3 = por %p656_p0, %p655_p12 }
  0x95   : > { %p658_p5 = pnand %p657_p3, %p651_p13 }
  0x97   : > { %661 = shalt.err (!%p658_p5)
}
  0x98   : > { %513 = dma.vmem_to_hbm [thread:$0]  (%p971_p2), %s900_s25, 16, %s898_s6, %s378_s7  }
  0x99 PF: > { %s402_s21 = sand.u32 1, %s709_s12   ;;  %p972_p8 = scmp.ne.s32.totalorder %s965_s29, 0 }
  0x9a   : > { %p973_p11 = scmp.ge.s32.totalorder %s737_s19, 2  ;;  %s403_s23 = scalar_lea.sflag [#allocation4], %s402_s21 }
  0x9c   : > { %p520_p1 = pnand %p973_p11, %p972_p8 }
  0x9e   : > { %703 = dma.done.wait (!%p520_p1), %s403_s23, 16  }
  0x9f   : > { %705 = vsyncadd (!%p520_p1), %s403_s23, 4294967280  ;;  %s19_s19 = sadd.s32 1, %s737_s19   ;;  %s974_s12 = smov %s713_s13 }
  0xa0   : > { %p16_p7 = scmp.ge.s32.totalorder %s19_s19, 4   ;;  %s975_s13 = smov %s717_s14 }
  0xa1   : > { %s976_s14 = smov %s820_s27  ;;  %s977_s15 = smov %s725_s16 }
  0xa2   : > { %s945_s16 = smov 0   ;;  %s978_s17 = smov %s733_s18 }
  0xa3   : > { %s979_s18 = smov %s981_s22  ;;  %18 = sbr.rel (!%p16_p7) target bundleno = 7 (0x7), region = 87 }
  0xaa   :  { %407 = vsyncpa [#allocation3], 1 }
  0xab   :  { %409 = vsyncpa [#allocation3 + $0x1], 1 }
  0xac   :  { %410 = vsyncpa [#allocation4], 1 }
  0xad   :  { %412 = vsyncpa [#allocation4 + $0x1], 1 }

</bundles_post_ra>
